<compile_context>
chip_gen: v7x
topology: tpu7x:2x2x1
jax: 0.10.0
libtpu: 0.0.40
codegen_flags: <defaults>
</compile_context>

<pallas_src>
import functools

import jax
import jax.numpy as jnp
from jax import lax
from jax.experimental import pallas as pl
from jax.experimental.pallas import tpu as pltpu

# ------------------------------ configuration -------------------------------
IN_FEA_LEN = 32        # input feature width of x (Din)
OUT_FEA_LEN = 32       # message_nn output width (F)
GATE_HIDDEN = 16       # gate_nn hidden width
MSG_HIDDEN = 16        # message_nn hidden width
N_SEGMENTS = 8         # number of pooling targets
N_INPUTS = 16          # number of pooled items = len(index)
LEAKY_SLOPE = 0.01     # torch.nn.LeakyReLU default


def _leaky_relu(x):
    return jnp.where(x > 0, x, LEAKY_SLOPE * x)


# --------------------------------- kernel ------------------------------------
def wap_kernel(
    x_ref,      # [E, Din]   f32  input features
    idx_ref,    # [E, 1]     i32  segment index (column layout)
    w_ref,      # [E, 1]     f32  per-item weights
    w1_ref,     # [Din, H]   f32  fused first-layer weights (gate || msg), H = Hg+Hm
    bias_ref,   # [1, H+F]   f32  packed biases: b1_gate || b1_msg || b2_msg
    w2g_ref,    # [1, H]     f32  gate-head row (zero-padded over msg hidden)
    w2m_ref,    # [H, F]     f32  msg-head weights (zero rows over gate hidden)
    scal_ref,   # (2,)       f32  SMEM: [pow, b2_gate]
    out_ref,    # [N, F]     f32  pooled output
):
    E = x_ref.shape[0]
    N = out_ref.shape[0]
    H = w1_ref.shape[1]

    x = x_ref[...]
    bias = bias_ref[...]          # [1, H+F]
    b1 = bias[:, :H]              # [1, H]
    b2m = bias[:, H:]             # [1, F]

    # ---- fused first layer for gate_nn and message_nn (single MXU op) ----
    h = jnp.dot(x, w1_ref[...], preferred_element_type=jnp.float32) + b1
    h = _leaky_relu(h)            # [E, H]

    # ---- gate head on the VPU (avoid a lane-width-1 MXU result) ----
    gate = jnp.sum(h * w2g_ref[...], axis=1, keepdims=True) + scal_ref[1]   # [E, 1]

    # ---- message head (zero-padded rows over the gate hidden) ----
    xm = jnp.dot(h, w2m_ref[...], preferred_element_type=jnp.float32) + b2m  # [E, F]

    # ---- segment one-hot built in register ([E, N], columns = segments) ----
    onehot = lax.broadcasted_iota(jnp.int32, (E, N), 1) == idx_ref[...]      # bool

    # ---- weighted softmax done entirely in the masked [E, N] domain ----
    # gate -= segment_max; gate = w**p * exp(gate); gate /= segment_sum + 1e-10
    p = scal_ref[0]
    # guard w == 0 so exp(p*log(w)) stays finite (matches w**p ~ 0 for p > 0)
    logw = jnp.log(jnp.maximum(w_ref[...], 1e-30))                            # [E, 1]
    neg = jnp.float32(-1e30)

    masked = jnp.where(onehot, gate, neg)                                     # [E, N]
    seg_max = jnp.max(masked, axis=0, keepdims=True)                          # [1, N]
    scores = jnp.where(onehot, p * logw + gate - seg_max, neg)                # [E, N]
    p_en = jnp.exp(scores)            # zeros off-segment fall out of the mask
    seg_sum = jnp.sum(p_en, axis=0, keepdims=True)                            # [1, N]
    p_en = p_en * pl.reciprocal(seg_sum + 1e-10)      # exact reciprocal      # [E, N]

    # ---- pooled output: out[n, f] = sum_e p_en[e, n] * xm[e, f] ----
    out_ref[...] = lax.dot_general(
        p_en, xm,
        dimension_numbers=(((0,), (0,)), ((), ())),
        preferred_element_type=jnp.float32,
    ).astype(out_ref.dtype)


# --------------------------------- wrapper ------------------------------------
@functools.partial(jax.jit, static_argnames=("num_segments",))
def weighted_attention_pooling(x, index, weights, params, *, num_segments):
    """WeightedAttentionPooling.forward(x, index, weights) -> [num_segments, F]."""
    E, _ = x.shape
    Hg = params["w1_gate"].shape[1]
    Hm = params["w1_msg"].shape[1]
    F = params["w2_msg"].shape[-1]

    idx_col = index.astype(jnp.int32).reshape(E, 1)

    # Pack parameters once (tiny ops; in a real model this is done at init).
    w1_cat = jnp.concatenate([params["w1_gate"], params["w1_msg"]], axis=1)      # [Din, H]
    bias_cat = jnp.concatenate(
        [params["b1_gate"], params["b1_msg"], params["b2_msg"]], axis=1)          # [1, H+F]
    w2g_row = jnp.concatenate(
        [params["w2_gate"].T, jnp.zeros((1, Hm), jnp.float32)], axis=1)           # [1, H]
    w2m_pad = jnp.concatenate(
        [jnp.zeros((Hg, F), jnp.float32), params["w2_msg"]], axis=0)              # [H, F]
    scal = jnp.concatenate([params["pow"], params["b2_gate"]]).astype(jnp.float32)  # (2,)

    vmem = pl.BlockSpec(memory_space=pltpu.MemorySpace.VMEM)
    smem = pl.BlockSpec(memory_space=pltpu.MemorySpace.SMEM)

    return pl.pallas_call(
        wap_kernel,
        out_shape=jax.ShapeDtypeStruct((num_segments, F), jnp.float32),
        in_specs=[vmem] * 7 + [smem],
        out_specs=vmem,
    )(x, idx_col, weights, w1_cat, bias_cat, w2g_row, w2m_pad, scal)


# ------------------------------ parameter init --------------------------------
def init_params(key, in_len, out_len, gate_hidden, msg_hidden):
    ks = jax.random.split(key, 9)
    s = 0.1
    return {
        # gate_nn: Linear(Din, Hg) -> LeakyReLU -> Linear(Hg, 1)
        "w1_gate": s * jax.random.normal(ks[0], (in_len, gate_hidden), jnp.float32),
        "b1_gate": s * jax.random.normal(ks[1], (1, gate_hidden), jnp.float32),
        "w2_gate": s * jax.random.normal(ks[2], (gate_hidden, 1), jnp.float32),
        "b2_gate": s * jax.random.normal(ks[3], (1,), jnp.float32),
        # message_nn: Linear(Din, Hm) -> LeakyReLU -> Linear(Hm, F)
        "w1_msg": s * jax.random.normal(ks[4], (in_len, msg_hidden), jnp.float32),
        "b1_msg": s * jax.random.normal(ks[5], (1, msg_hidden), jnp.float32),
        "w2_msg": s * jax.random.normal(ks[6], (msg_hidden, out_len), jnp.float32),
        "b2_msg": s * jax.random.normal(ks[7], (1, out_len), jnp.float32),
        # WeightedAttentionPooling.pow ~ torch.randn(1)
        "pow": jax.random.normal(ks[8], (1,), jnp.float32),
    }


# -------------------------------- reference -----------------------------------
def weighted_attention_pooling_reference(x, index, weights, params, num_segments):
    """Pure-JAX mirror of the PyTorch forward (for verification)."""
    gate = _leaky_relu(x @ params["w1_gate"] + params["b1_gate"])
    gate = gate @ params["w2_gate"] + params["b2_gate"]                       # [E,1]
    seg_max = jax.ops.segment_max(gate, index, num_segments=num_segments)
    gate = gate - seg_max[index]
    gate = weights ** params["pow"] * jnp.exp(gate)
    seg_sum = jax.ops.segment_sum(gate, index, num_segments=num_segments)
    gate = gate / (seg_sum[index] + 1e-10)
    xm = _leaky_relu(x @ params["w1_msg"] + params["b1_msg"])
    xm = xm @ params["w2_msg"] + params["b2_msg"]                             # [E,F]
    return jax.ops.segment_sum(gate * xm, index, num_segments=num_segments)


# ----------------------------------- main --------------------------------------
if __name__ == "__main__":
    key = jax.random.PRNGKey(0)
    kp, kw, kx = jax.random.split(key, 3)

    params = init_params(kp, IN_FEA_LEN, OUT_FEA_LEN, GATE_HIDDEN, MSG_HIDDEN)

    # deterministic segment structure: each segment owns 2 consecutive inputs
    index = jnp.repeat(jnp.arange(N_SEGMENTS, dtype=jnp.int32),
                       N_INPUTS // N_SEGMENTS)                                # [E]
    weights = jax.random.uniform(kw, (N_INPUTS, 1), jnp.float32,
                                 minval=0.1, maxval=1.0)                      # positive
    x = jax.random.normal(kx, (N_INPUTS, IN_FEA_LEN), jnp.float32)

    out = weighted_attention_pooling(x, index, weights, params,
                                     num_segments=N_SEGMENTS)
    out = jax.block_until_ready(out)

    ref = weighted_attention_pooling_reference(x, index, weights, params, N_SEGMENTS)
    assert out.shape == (N_SEGMENTS, OUT_FEA_LEN)
    assert jnp.allclose(out, ref, rtol=1e-3, atol=1e-4), "mismatch vs reference"

    print("KERNEL_OK")
</pallas_src>

<mosaic_0001>
module attributes {stable_mosaic.version = 11 : i64} {
  func.func @wap_kernel(%arg0: memref<16x32xf32, #tpu.memory_space<vmem>>, %arg1: memref<16x1xi32, #tpu.memory_space<vmem>>, %arg2: memref<16x1xf32, #tpu.memory_space<vmem>>, %arg3: memref<32x32xf32, #tpu.memory_space<vmem>>, %arg4: memref<1x64xf32, #tpu.memory_space<vmem>>, %arg5: memref<1x32xf32, #tpu.memory_space<vmem>>, %arg6: memref<32x32xf32, #tpu.memory_space<vmem>>, %arg7: memref<2xf32, #tpu.memory_space<smem>>, %arg8: memref<8x32xf32, #tpu.memory_space<vmem>>) attributes {dimension_semantics = [], scalar_prefetch = 0 : i64, scratch_operands = 0 : i64, tpu.core_type = #tpu.core_type<tc>} {
    %c0 = arith.constant 0 : index
    %c0_0 = arith.constant 0 : index
    %0 = vector.load %arg0[%c0, %c0_0] : memref<16x32xf32, #tpu.memory_space<vmem>>, vector<16x32xf32>
    %c0_1 = arith.constant 0 : index
    %c0_2 = arith.constant 0 : index
    %1 = vector.load %arg4[%c0_1, %c0_2] : memref<1x64xf32, #tpu.memory_space<vmem>>, vector<1x64xf32>
    %2 = vector.extract_strided_slice %1 {offsets = [0, 0], sizes = [1, 32], strides = [1, 1]} : vector<1x64xf32> to vector<1x32xf32>
    %3 = vector.extract_strided_slice %1 {offsets = [0, 32], sizes = [1, 32], strides = [1, 1]} : vector<1x64xf32> to vector<1x32xf32>
    %c0_3 = arith.constant 0 : index
    %c0_4 = arith.constant 0 : index
    %4 = vector.load %arg3[%c0_3, %c0_4] : memref<32x32xf32, #tpu.memory_space<vmem>>, vector<32x32xf32>
    %cst = arith.constant dense<0.000000e+00> : vector<16x32xf32>
    %5 = tpu.matmul %0, %4, %cst {dimension_numbers = #tpu.dot_dimension_numbers<[1], [0], [0], [1], [0, 0, 1, 1], [], []>} : vector<16x32xf32>, vector<32x32xf32>, vector<16x32xf32> -> vector<16x32xf32>
    %6 = vector.broadcast %2 : vector<1x32xf32> to vector<16x32xf32>
    %7 = arith.addf %5, %6 : vector<16x32xf32>
    %cst_5 = arith.constant 0.000000e+00 : f32
    %8 = vector.broadcast %cst_5 : f32 to vector<16x32xf32>
    %9 = arith.cmpf ogt, %7, %8 : vector<16x32xf32>
    %cst_6 = arith.constant 0.00999999977 : f32
    %10 = vector.broadcast %cst_6 : f32 to vector<16x32xf32>
    %11 = arith.mulf %10, %7 : vector<16x32xf32>
    %12 = arith.select %9, %7, %11 : vector<16x32xi1>, vector<16x32xf32>
    %c0_7 = arith.constant 0 : index
    %c0_8 = arith.constant 0 : index
    %13 = vector.load %arg5[%c0_7, %c0_8] : memref<1x32xf32, #tpu.memory_space<vmem>>, vector<1x32xf32>
    %14 = vector.broadcast %13 : vector<1x32xf32> to vector<16x32xf32>
    %15 = arith.mulf %12, %14 : vector<16x32xf32>
    %cst_9 = arith.constant dense<0.000000e+00> : vector<16xf32>
    %16 = vector.multi_reduction <add>, %15, %cst_9 [1] : vector<16x32xf32> to vector<16xf32>
    %17 = vector.shape_cast %16 : vector<16xf32> to vector<16x1xf32>
    %c1 = arith.constant 1 : index
    %18 = memref.load %arg7[%c1] : memref<2xf32, #tpu.memory_space<smem>>
    %19 = vector.broadcast %18 : f32 to vector<16x1xf32>
    %20 = arith.addf %17, %19 : vector<16x1xf32>
    %c0_10 = arith.constant 0 : index
    %c0_11 = arith.constant 0 : index
    %21 = vector.load %arg6[%c0_10, %c0_11] : memref<32x32xf32, #tpu.memory_space<vmem>>, vector<32x32xf32>
    %cst_12 = arith.constant dense<0.000000e+00> : vector<16x32xf32>
    %22 = tpu.matmul %12, %21, %cst_12 {dimension_numbers = #tpu.dot_dimension_numbers<[1], [0], [0], [1], [0, 0, 1, 1], [], []>} : vector<16x32xf32>, vector<32x32xf32>, vector<16x32xf32> -> vector<16x32xf32>
    %23 = vector.broadcast %3 : vector<1x32xf32> to vector<16x32xf32>
    %24 = arith.addf %22, %23 : vector<16x32xf32>
    %25 = tpu.iota {dimensions = array<i32: 1>} : vector<16x8xi32>
    %c0_13 = arith.constant 0 : index
    %c0_14 = arith.constant 0 : index
    %26 = vector.load %arg1[%c0_13, %c0_14] : memref<16x1xi32, #tpu.memory_space<vmem>>, vector<16x1xi32>
    %27 = vector.broadcast %26 : vector<16x1xi32> to vector<16x8xi32>
    %28 = arith.cmpi eq, %25, %27 : vector<16x8xi32>
    %c0_15 = arith.constant 0 : index
    %29 = memref.load %arg7[%c0_15] : memref<2xf32, #tpu.memory_space<smem>>
    %c0_16 = arith.constant 0 : index
    %c0_17 = arith.constant 0 : index
    %30 = vector.load %arg2[%c0_16, %c0_17] : memref<16x1xf32, #tpu.memory_space<vmem>>, vector<16x1xf32>
    %cst_18 = arith.constant 1.000000e-30 : f32
    %31 = vector.broadcast %cst_18 : f32 to vector<16x1xf32>
    %32 = arith.maximumf %30, %31 : vector<16x1xf32>
    %33 = math.log %32 : vector<16x1xf32>
    %cst_19 = arith.constant -1.000000e+30 : f32
    %34 = vector.shape_cast %20 : vector<16x1xf32> to vector<16x1xf32>
    %35 = vector.broadcast %34 : vector<16x1xf32> to vector<16x8xf32>
    %36 = vector.broadcast %cst_19 : f32 to vector<16x8xf32>
    %37 = arith.select %28, %35, %36 : vector<16x8xi1>, vector<16x8xf32>
    %cst_20 = arith.constant dense<0xFF800000> : vector<8xf32>
    %38 = vector.multi_reduction <maximumf>, %37, %cst_20 [0] : vector<16x8xf32> to vector<8xf32>
    %39 = vector.shape_cast %38 : vector<8xf32> to vector<1x8xf32>
    %40 = vector.broadcast %29 : f32 to vector<16x1xf32>
    %41 = arith.mulf %40, %33 : vector<16x1xf32>
    %42 = arith.addf %41, %20 : vector<16x1xf32>
    %43 = vector.broadcast %42 : vector<16x1xf32> to vector<16x8xf32>
    %44 = vector.broadcast %39 : vector<1x8xf32> to vector<16x8xf32>
    %45 = arith.subf %43, %44 : vector<16x8xf32>
    %cst_21 = arith.constant -1.000000e+30 : f32
    %46 = vector.broadcast %cst_21 : f32 to vector<16x8xf32>
    %47 = arith.select %28, %45, %46 : vector<16x8xi1>, vector<16x8xf32>
    %48 = math.exp %47 : vector<16x8xf32>
    %cst_22 = arith.constant dense<0.000000e+00> : vector<8xf32>
    %49 = vector.multi_reduction <add>, %48, %cst_22 [0] : vector<16x8xf32> to vector<8xf32>
    %50 = vector.shape_cast %49 : vector<8xf32> to vector<1x8xf32>
    %cst_23 = arith.constant 1.000000e-10 : f32
    %51 = vector.broadcast %cst_23 : f32 to vector<1x8xf32>
    %52 = arith.addf %50, %51 : vector<1x8xf32>
    %53 = tpu.reciprocal %52 : vector<1x8xf32> -> vector<1x8xf32>
    %54 = vector.broadcast %53 : vector<1x8xf32> to vector<16x8xf32>
    %55 = arith.mulf %48, %54 : vector<16x8xf32>
    %cst_24 = arith.constant dense<0.000000e+00> : vector<8x32xf32>
    %56 = tpu.matmul %55, %24, %cst_24 {dimension_numbers = #tpu.dot_dimension_numbers<[0], [0], [1], [1], [0, 1, 1, 1], [], []>} : vector<16x8xf32>, vector<16x32xf32>, vector<8x32xf32> -> vector<8x32xf32>
    %c0_25 = arith.constant 0 : index
    %c0_26 = arith.constant 0 : index
    %57 = vector.load %arg8[%c0_25, %c0_26] : memref<8x32xf32, #tpu.memory_space<vmem>>, vector<8x32xf32>
    tpu.vector_store %arg8[%c0_25, %c0_26], %56 {strides = array<i32>} : memref<8x32xf32, #tpu.memory_space<vmem>>, vector<8x32xf32>,
    return
  }
}

</mosaic_0001>

<bundles_post_ra>
// kernel: weighted_attention_pooling.1
= control target key start
LH: loop header
LB: loop body
LE: loop exit
PB: predicated region body
PF: predicated region fallthrough
CT: control target
= control target key end

     0   :  { %13 = vsyncpa [#allocation4], 0  ;;  %s700_s0 = inlined_call_operand.vmem [shape: f32[16,32], index: 0, kind: input, shape index: {}]   ;;  %s701_s1 = inlined_call_operand.vmem [shape: s32[16,1], index: 1, kind: input, shape index: {}]   ;;  %s702_s2 = inlined_call_operand.vmem [shape: f32[16,1], index: 2, kind: input, shape index: {}]   ;;  %s703_s3 = inlined_call_operand.vmem [shape: f32[32,32], index: 3, kind: input, shape index: {}]   ;;  %s704_s4 = inlined_call_operand.vmem [shape: f32[1,64], index: 4, kind: input, shape index: {}]   ;;  %s705_s5 = inlined_call_operand.vmem [shape: f32[1,32], index: 5, kind: input, shape index: {}]   ;;  %s706_s6 = inlined_call_operand.vmem [shape: f32[32,32], index: 6, kind: input, shape index: {}]   ;;  %s707_s7 = inlined_call_operand.vmem [shape: f32[2], index: 7, kind: input, shape index: {}]   ;;  %s708_s8 = inlined_call_operand.hbm [shape: f32[8,32], index: 8, kind: output, shape index: {}]  }
   0x1   :  { %14 = vsyncpa [#allocation3], 0  ;;  %s35_s29 = sshll.u32 %s707_s7, 4  ;;  %s36_s29 = int_to_ptr.vmem [resolvable:$true] %s35_s29 }
   0x2   :  { %s532_s30 = scalar_lea.vmem %s36_s29, 16  ;;  %p537_p1 = scmp.lt.s32.totalorder %s36_s29, %s36_s29 }
   0x3   :  { %p533_p0 = scmp.ne.s32.totalorder %s36_s29, %s532_s30  ;;  %p538_p2 = scmp.lt.s32.totalorder %s532_s30, %s532_s30 }
   0x5   :  { %p539_p3 = por %p538_p2, %p537_p1 }
   0x7   :  { %p540_p4 = pnand %p539_p3, %p533_p0 }
   0x9   :  { %543 = shalt.err (!%p540_p4)
}
   0xa   :  { %s570_s9 = smov [#allocation2]  }
   0xb   :  { %38 = dma.vmem_to_smem %s36_s29, 16, %s570_s9, [#allocation4]  }
   0xc   :  { %566 = dma.done.wait [#allocation4], 16  }
   0xd   :  { %567 = vsyncadd [#allocation4], 4294967280 }
   0xe   :  { %42 = sfence }
   0xf   :  { %v46_v0 = vld [vmem:[%s703_s3] sm:$0xff]  ;;  %v47_v1 = vld [vmem:[%s703_s3 + $0x8] sm:$0xff]  ;;  %v48_v2 = vld [vmem:[%s703_s3 + $0x10] sm:$0xff]  ;;  %vm56_vm0 = vcmask 261120   ;;  %v571_v15 = vmov 0   ;;  %s263_s13 = sld [smem:[#allocation2]]  ;;  %v251_v36 = vlaneseq }
  0x10   :  { %v494_v3 = vpack.c.bf16 %v47_v1, %v46_v0  ;;  %v49_v4 = vld [vmem:[%s703_s3 + $0x18] sm:$0xff]  ;;  %v43_v5 = vld [vmem:[%s700_s0] sm:$0xff]  ;;  %v44_v7 = vld [vmem:[%s700_s0 + $0x8] sm:$0xff]  ;;  %520 = vset.pattern.permute.xlu1 %v571_v15  ;;  %521 = vset.pattern.permute.xlu0 %v571_v15  ;;  %s446_s7 = sld [smem:[#allocation2 + $0x1]]  ;;  %vm274_vm5 = vcmask 64512   ;;  %v573_v58 = vmov 0.0|0.0  }
  0x11   :  { %v498_v6 = vpack.c.bf16 %v49_v4, %v48_v2  ;;  %473 = vmatprep.mubr.msk.f32.mxu0 %vm56_vm0, %v43_v5  ;;  %v163_v8 = vld [vmem:[%s706_s6] sm:$0xff]  ;;  %v164_v9 = vld [vmem:[%s706_s6 + $0x8] sm:$0xff]  ;;  %v165_v11 = vld [vmem:[%s706_s6 + $0x10] sm:$0xff]  ;;  %v252_v42 = vand.u32 127, %v251_v36  ;;  %vm574_vm6 = vmmov 0   ;;  %v575_v59 = vmov 0.0  }
  0x12   :  { %495 = vmatprep.subr.bf16.mxu0 %v494_v3  ;;  %v502_v10 = vpack.c.bf16 %v164_v9, %v163_v8  ;;  %v166_v12 = vld [vmem:[%s706_s6 + $0x18] sm:$0xff]  ;;  %v253_v14 = vld [vmem:[%s701_s1] sm:$0xff]  ;;  %v254_v16 = vld [vmem:[%s701_s1 + $0x8] sm:$0xff]  ;;  %vm352_vm7 = vcmask 130048   ;;  %s576_s14 = smov [#allocation5]  }
  0x13   :  { %497 = vmatpush3.bf16.msra.mxu0 %v494_v3  ;;  %v506_v13 = vpack.c.bf16 %v166_v12, %v165_v11  ;;  %256 = vperm.xlu1 %520, %v253_v14   ;;  %v442_v17 = vld [vmem:[%s704_s4] ss:$0 sm:$0xff]  ;;  %v265_v33 = vld [vmem:[%s702_s2 + $0x8] sm:$0xff]  ;;  %s433_s15 = sshll.u32 %s576_s14, 4  ;;  %s434_s15 = int_to_ptr.vmem [resolvable:$true] %s433_s15 }
  0x14   :  { %499 = vmatprep.subr.bf16.mxu0 %v498_v6  ;;  %503 = vmatprep.subr.bf16.mxu1 %v502_v10  ;;  %v445_v24 = vld [vmem:[%s705_s5] ss:$0 sm:$0xff]  ;;  %v267_v34 = vmax.f32 %v265_v33, 1e-30  ;;  %s544_s16 = scalar_lea.vmem %s434_s15, 128  ;;  %p549_p6 = scmp.lt.s32.totalorder %s434_s15, %s434_s15 }
  0x15   :  { %505 = vmatpush3.bf16.msra.mxu1 %v502_v10  ;;  %v264_v31 = vld [vmem:[%s702_s2] sm:$0xff]  ;;  %v284_v40 = vstv %s263_s13  ;;  %s572_s2 = smov 96   ;;  %p545_p5 = scmp.ne.s32.totalorder %s434_s15, %s544_s16 }
  0x16   :  { %507 = vmatprep.subr.bf16.mxu1 %v506_v13  ;;  %v266_v32 = vmax.f32 %v264_v31, 1e-30  ;;  %v160_v41 = vstv %s446_s7  ;;  %p550_p7 = scmp.lt.s32.totalorder %s544_s16, %s544_s16 }
  0x17   :  { %501 = vmatpush3.bf16.msra.mxu0 %v498_v6  ;;  %259 = vperm.xlu1 %520, %v254_v16  }
  0x18   :  { %522 = vlog2.f32 %v266_v32  ;;  %510 = vmatprep.subr.bf16.mxu0 %v573_v58  ;;  %p551_p8 = por %p550_p7, %p549_p6 }
  0x19   :  { %509 = vmatpush3.bf16.msra.mxu1 %v506_v13  ;;  %524 = vlog2.f32 %v267_v34 }
  0x1a   :  { %474 = vmatmul.mubr.msk.f32.vlgmr.msra.gmra.mrb[0].mxu0 %vm56_vm0, %v44_v7  ;;  %p552_p9 = pnand %p551_p8, %p545_p5 }
  0x1b   :  { %491 = vmatprep.mubr.msk.f32.mxu0 %vm574_vm6, %v575_v59 }
  0x22   :  { %v523_v35 = vpop.eup %522 }
  0x23   :  { %v269_v37 = vmul.f32 0.6931472, %v523_v35  ;;  %v525_v39 = vpop.eup %524 }
  0x24   :  { %v271_v44 = vmul.f32 0.6931472, %v525_v39 }
  0x25   :  { %v285_v43 = vmul.f32 %v284_v40, %v269_v37 }
  0x26   :  { %v286_v49 = vmul.f32 %v284_v40, %v271_v44 }
  0x92   :  { %v257_v38 = vpop.permute.xlu1 %256 }
  0x93   :  { %vm261_vm3 = vcmp.eq.s32.totalorder %v252_v42, %v257_v38 }
  0x96   :  { %v260_v47 = vpop.permute.xlu1 %259 }
  0x97   :  { %vm262_vm4 = vcmp.eq.s32.totalorder %v252_v42, %v260_v47 }
  0xed   :  { %v475_v18 = vpop.f32.mrb[0].mxu0 }
  0xee   :  { %v135_v19 = vadd.f32 %v475_v18, %v442_v17  ;;  %v129_v20 = vpop.f32.mrb[1].mxu0 }
  0xef   :  { %v130_v21 = vadd.f32 %v442_v17, %v129_v20 }
  0xf0   :  { %vm139_vm1 = vcmp.gt.f32.partialorder %v135_v19, 0.0  ;;  %v141_v22 = vmul.f32 0.01, %v135_v19 }
  0xf1   :  { %vm138_vm2 = vcmp.gt.f32.partialorder %v130_v21, 0.0  ;;  %v140_v23 = vmul.f32 0.01, %v130_v21 }
  0xf2   :  { %v143_v26 = vsel %vm139_vm1, %v135_v19, %v141_v22 }
  0xf3   :  { %v142_v25 = vsel %vm138_vm2, %v130_v21, %v140_v23  ;;  %v152_v29 = vmul.f32 %v445_v24, %v143_v26 }
  0xf4   :  { %v151_v27 = vmul.f32 %v445_v24, %v142_v25  ;;  %484 = vmatprep.mubr.msk.f32.mxu1 %vm56_vm0, %v142_v25 }
  0xf5   :  { %485 = vmatmul.mubr.msk.f32.vlgmr.msra.gmra.mrb[0].mxu1 %vm56_vm0, %v143_v26  ;;  %v156_v30 = vsel %vm56_vm0, %v152_v29, 0.0 }
  0xf6   :  { %v153_v28 = vsel %vm56_vm0, %v151_v27, 0.0 }
  0xf7   :  { %154 = vadd.xlane.f32.xlu0 %v153_v28 }
  0xfb   :  { %157 = vadd.xlane.f32.xlu0 %v156_v30 }
 0x184   :  { %v155_v45 = vpop.xlane.xlu0 %154 }
 0x185   :  { %v161_v46 = vadd.f32 %v160_v41, %v155_v45 }
 0x187   :  { %v287_v48 = vadd.f32 %v285_v43, %v161_v46  ;;  %v272_v51 = vsel %vm261_vm3, %v161_v46, -1e+30 }
 0x188   :  { %v158_v50 = vpop.xlane.xlu0 %157  ;;  %v275_v55 = vsel %vm274_vm5, %v272_v51, -inf }
 0x189   :  { %v162_v52 = vadd.f32 %v160_v41, %v158_v50  ;;  %291 = vperm.xlu0 %521, %v287_v48  }
 0x18b   :  { %v288_v53 = vadd.f32 %v286_v49, %v162_v52  ;;  %v273_v54 = vsel %vm262_vm4, %v162_v52, -1e+30 }
 0x18c   :  { %v276_v56 = vsel %vm274_vm5, %v273_v54, -inf }
 0x18d   :  { %v277_v57 = vmax.f32 %v275_v55, %v276_v56  ;;  %296 = vperm.xlu1 %520, %v288_v53  }
 0x18f   :  { %v278_v62 = vrot.slane %v277_v57, 4 }
 0x191   :  { %167 = vrot.lane.b32.xlu1 %v442_v17, %s572_s2  ;;  %v279_v63 = vmax.f32 %v277_v57, %v278_v62 }
 0x193   :  { %v280_v0 = vrot.slane %v279_v63, 2 }
 0x195   :  { %v281_v1 = vmax.f32 %v279_v63, %v280_v0 }
 0x197   :  { %v282_v2 = vrot.slane %v281_v1, 1 }
 0x199   :  { %v283_v3 = vmax.f32 %v281_v1, %v282_v2 }
 0x1c8   :  { %v486_v60 = vpop.f32.mrb[0].mxu1 }
 0x1c9   :  { %v242_v61 = vpop.f32.mrb[1].mxu1 }
 0x208   :  { %v292_v4 = vpop.permute.xlu0 %291 }
 0x209   :  { %v299_v5 = vsub.f32 %v292_v4, %v283_v3 }
 0x20b   :  { %v301_v6 = vsel %vm261_vm3, %v299_v5, -1e+30 }
 0x20c   :  { %v303_v7 = vmul.f32 1.442695, %v301_v6  ;;  %v297_v8 = vpop.permute.xlu1 %296 }
 0x20d   :  { %v300_v9 = vsub.f32 %v297_v8, %v283_v3 }
 0x20e   :  { %526 = vpow2.f32 %v303_v7 }
 0x20f   :  { %v302_v10 = vsel %vm262_vm4, %v300_v9, -1e+30 }
 0x210   :  { %v305_v11 = vmul.f32 1.442695, %v302_v10  ;;  %v168_v12 = vpop.permute.xlu1 %167 }
 0x211   :  { %v243_v13 = vadd.f32 %v242_v61, %v168_v12  ;;  %v248_v14 = vadd.f32 %v486_v60, %v168_v12 }
 0x212   :  { %528 = vpow2.f32 %v305_v11 }
 0x213   :  { %v511_v15 = vpack.c.bf16 %v248_v14, %v243_v13 }
 0x215   :  { %512 = vmatpush3.bf16.msra.mxu0 %v511_v15 }
 0x218   :  { %v527_v16 = vpop.eup %526 }
 0x219   :  { %v307_v18 = vsel %vm274_vm5, %v527_v16, 0.0 }
 0x21c   :  { %v529_v17 = vpop.eup %528 }
 0x21d   :  { %v308_v19 = vsel %vm274_vm5, %v529_v17, 0.0 }
 0x21e   :  { %v309_v20 = vadd.f32 %v308_v19, %v307_v18 }
 0x220   :  { %v310_v21 = vrot.slane %v309_v20, 4 }
 0x222   :  { %v311_v22 = vadd.f32 %v310_v21, %v309_v20 }
 0x224   :  { %v312_v23 = vrot.slane %v311_v22, 2 }
 0x226   :  { %v313_v24 = vadd.f32 %v312_v23, %v311_v22 }
 0x228   :  { %v314_v25 = vrot.slane %v313_v24, 1 }
 0x22a   :  { %v315_v26 = vadd.f32 %v314_v25, %v313_v24 }
 0x22c   :  { %v316_v27 = vadd.f32 1e-10, %v315_v26 }
 0x22e   :  { %530 = vrcp.f32 %v316_v27 }
 0x238   :  { %v531_v28 = vpop.eup %530 }
 0x239   :  { %v318_v29 = vmul.f32 %v531_v28, %v527_v16  ;;  %v319_v30 = vmul.f32 %v531_v28, %v529_v17 }
 0x23b   :  { %320 = vxpose.xlu1.b32.start [1/2] (short) (narrow) %v318_v29, 8 }
 0x23f   :  { %321 = vxpose.xlu1.b32.end [2/2] (short) (narrow) %v319_v30, 8 }
 0x2bb   :  { %v336_v31 = vpop.trf.xlu1 }
 0x2bc   :  { %492 = vmatmul.mubr.msk.f32.vlgmr.msra.gmra.mrb[2].mxu0 %vm352_vm7, %v336_v31 }
 0x38f   :  { %v422_v32 = vpop.f32.mrb[2].mxu0 }
 0x390   :  { %426 = vst.msk [vmem:[#allocation5] sm:$0xff] %vm56_vm0, %v422_v32  ;;  %v493_v33 = vpop.f32.mrb[3].mxu0 }
 0x391   :  { %555 = shalt.err (!%p552_p9)
}
 0x392   :  { %s556_s19 = scalar_lea.hbm %s708_s8, 128 }
 0x393   :  { %p557_p10 = scmp.ne.s32.totalorder %s708_s8, %s556_s19  ;;  %p560_p11 = scmp.lt.u32.totalorder %s556_s19, %s708_s8 }
 0x395   :  { %p562_p12 = pnand %p560_p11, %p557_p10 }
 0x397   :  { %565 = shalt.err (!%p562_p12)
}
 0x398   :  { %436 = dma.vmem_to_hbm [thread:$0]  %s434_s15, 128, %s708_s8, [#allocation3]  }
 0x399   :  { %568 = dma.done.wait [#allocation3], 128  }
 0x39a   :  { %569 = vsyncadd [#allocation3], 4294967168 }
 0x39b   :  { %440 = vsyncpa [#allocation3], 1 }
 0x39c   :  { %441 = vsyncpa [#allocation4], 1 }

</bundles_post_ra>
